<compile_context>
chip_gen: v7x
topology: tpu7x:2x2x1
jax: 0.10.0
libtpu: 0.0.40
codegen_flags: <defaults>
</compile_context>

<pallas_src>
import functools

import jax
import jax.numpy as jnp
from jax.experimental import pallas as pl
from jax.experimental.pallas import tpu as pltpu


def clf_head_kernel(h_ref, wp_ref, bp_ref, wc_ref, bc_ref, o_ref, acc_ref,
                    *, seq_len, t_tile):
    # h_ref:  [Bt, Tt, H]   wp_ref: [H, P]   bp_ref: [1, P]
    # wc_ref: [P, Lp]       bc_ref: [1, Lp]  o_ref:  [Bt, Lp]
    # acc_ref (VMEM scratch): [Bt, H] f32 running time-sum.
    t = pl.program_id(1)
    last_t = pl.num_programs(1) - 1

    @pl.when(t == 0)
    def _():
        acc_ref[...] = jnp.zeros_like(acc_ref)

    rem = seq_len % t_tile  # static Python int
    if rem == 0:
        # Steady state (every tile is full): pure load + f32 accumulate.
        acc_ref[...] += jnp.sum(h_ref[...].astype(jnp.float32), axis=1)
    else:
        @pl.when(t != last_t)
        def _():
            # Full tiles: no masking work on the hot streaming path.
            acc_ref[...] += jnp.sum(h_ref[...].astype(jnp.float32), axis=1)

        @pl.when(t == last_t)
        def _():
            # Partial last tile: statically slice the `rem` valid rows, so
            # undefined out-of-bounds block data (possibly NaN) is never read.
            acc_ref[...] += jnp.sum(
                h_ref[:, :rem, :].astype(jnp.float32), axis=1)

    # Finalize once per batch tile: exact mean, projector + tanh, classifier.
    @pl.when(t == last_t)
    def _():
        pooled = acc_ref[...] * (1.0 / seq_len)                      # [Bt, H]
        proj = jnp.tanh(
            jnp.dot(pooled, wp_ref[...], preferred_element_type=jnp.float32)
            + bp_ref[...])                                           # [Bt, P]
        logits = (jnp.dot(proj, wc_ref[...],
                          preferred_element_type=jnp.float32)
                  + bc_ref[...])                                     # [Bt, Lp]
        o_ref[...] = logits.astype(o_ref.dtype)


def _device_vmem_capacity_bytes():
    # v7x has only 64 MiB of VMEM per TensorCore (v5e/v6e: 128 MiB); size
    # tiles / the scoped-VMEM limit against the real part, not a constant.
    try:
        return int(pltpu.get_tpu_info().vmem_capacity_bytes)
    except Exception:
        return 64 << 20  # conservative fallback (v7x per-TC VMEM)


def _build_call(*, B, T, H, P, Lp, b_tile, t_tile, vmem_limit, cost,
                stream_bufs, single_buffer_weights):
    kernel = functools.partial(clf_head_kernel, seq_len=T, t_tile=t_tile)

    if single_buffer_weights:
        # Constant index maps never revisit HBM: single-buffer the resident
        # weights (saves ~2x(H*P*4) VMEM — matters inside v7x's 64 MiB) and
        # multi-buffer the streamed input to hide per-grid-step overhead.
        stream_mode = pl.Buffered(stream_bufs)
        weight_mode = pl.Buffered(1)
        in_specs = [
            pl.BlockSpec((b_tile, t_tile, H), lambda b, t: (b, t, 0),
                         pipeline_mode=stream_mode),
            pl.BlockSpec((H, P), lambda b, t: (0, 0), pipeline_mode=weight_mode),
            pl.BlockSpec((1, P), lambda b, t: (0, 0), pipeline_mode=weight_mode),
            pl.BlockSpec((P, Lp), lambda b, t: (0, 0), pipeline_mode=weight_mode),
            pl.BlockSpec((1, Lp), lambda b, t: (0, 0), pipeline_mode=weight_mode),
        ]
    else:
        in_specs = [
            pl.BlockSpec((b_tile, t_tile, H), lambda b, t: (b, t, 0)),
            pl.BlockSpec((H, P), lambda b, t: (0, 0)),
            pl.BlockSpec((1, P), lambda b, t: (0, 0)),
            pl.BlockSpec((P, Lp), lambda b, t: (0, 0)),
            pl.BlockSpec((1, Lp), lambda b, t: (0, 0)),
        ]

    return pl.pallas_call(
        kernel,
        out_shape=jax.ShapeDtypeStruct((B, Lp), jnp.float32),
        grid_spec=pltpu.PrefetchScalarGridSpec(
            num_scalar_prefetch=0,
            grid=(B // b_tile, pl.cdiv(T, t_tile)),
            in_specs=in_specs,
            out_specs=pl.BlockSpec((b_tile, Lp), lambda b, t: (b, 0)),
            scratch_shapes=[pltpu.VMEM((b_tile, H), jnp.float32)],
        ),
        compiler_params=pltpu.CompilerParams(
            dimension_semantics=("parallel", "arbitrary"),
            vmem_limit_bytes=vmem_limit,
        ),
        cost_estimate=cost,
    )


def model_for_clf_head(hidden_states, w_proj, b_proj, w_clf, b_clf,
                       *, b_tile=None, t_tile=None):
    """hidden_states: [B, T, H] (f32 or bf16) -> logits [B, num_labels] f32.

    The pooling stream is pure HBM bandwidth; pass the backbone output in
    bf16 where possible (halves bytes) — accumulation/matmuls stay f32.
    """
    B, T, H = hidden_states.shape
    P = w_proj.shape[1]
    L = w_clf.shape[1]
    itemsize = jnp.dtype(hidden_states.dtype).itemsize

    # Lane-dense output: pad classifier columns to a multiple of 128.
    Lp = ((L + 127) // 128) * 128
    if Lp != L:
        w_clf_p = jnp.pad(w_clf, ((0, 0), (0, Lp - L)))
        b_clf_p = jnp.pad(b_clf, ((0, 0), (0, Lp - L)))
    else:
        w_clf_p, b_clf_p = w_clf, b_clf

    # Batch tile: sublane-aligned with >= 2 steps on the "parallel" axis when
    # B >= 16, so both v7x TensorCores get work; otherwise the full B.
    if b_tile is None:
        b_tile = 8 if (B > 8 and B % 8 == 0) else B
        # TODO(synk): for B <= 8 on v7x one TensorCore idles; splitting the
        # time reduction over a leading parallel axis would need a 2nd pass.
    assert B % b_tile == 0 and (b_tile == B or b_tile % 8 == 0)

    # Device-/dtype-aware time tile: keep the multi-buffered streamed input
    # within ~45% of the real VMEM capacity (64 MiB on v7x, 128 on v5e/v6e).
    vmem_cap = _device_vmem_capacity_bytes()
    vmem_budget = int(vmem_cap * 0.9)
    weight_bytes = (H * P + P + P * Lp + Lp) * 4
    if t_tile is None:
        per_t_bytes = b_tile * H * itemsize
        fit = max(8, int(0.45 * vmem_budget) // (3 * per_t_bytes))
        t_tile = min(T, 1024, fit)
        if t_tile < T:
            t_tile = max(8, (t_tile // 8) * 8)
    assert t_tile == T or (t_tile % 8 == 0 and 0 < t_tile <= T)

    num_t = pl.cdiv(T, t_tile)
    stream_bufs = 3 if num_t >= 4 else 2

    tile_bytes = b_tile * t_tile * H * itemsize
    need = (stream_bufs * tile_bytes + weight_bytes
            + 2 * b_tile * Lp * 4 + b_tile * H * 4 + (2 << 20))
    vmem_limit = int(min(vmem_budget, max(16 << 20, need)))

    cost = pl.CostEstimate(
        flops=B * T * H + 2 * B * H * P + 2 * B * P * Lp,
        transcendentals=B * P,
        bytes_accessed=B * T * H * itemsize + weight_bytes + B * Lp * 4,
    )

    common = dict(B=B, T=T, H=H, P=P, Lp=Lp, b_tile=b_tile, t_tile=t_tile,
                  vmem_limit=vmem_limit, cost=cost, stream_bufs=stream_bufs)
    args = (hidden_states, w_proj, b_proj, w_clf_p, b_clf_p)
    try:
        logits_padded = _build_call(single_buffer_weights=True, **common)(*args)
    except Exception:
        # pl.Buffered / pipeline_mode not supported on this jax build: fall
        # back to default double-buffering (semantics unchanged).
        logits_padded = _build_call(single_buffer_weights=False, **common)(*args)

    return logits_padded[:, :L]


def init_params(key, hidden_size, proj_size, num_labels):
    """Deterministic PyTorch-style Linear init: U(-1/sqrt(fan_in), 1/sqrt(fan_in))."""
    k1, k2, k3, k4 = jax.random.split(key, 4)
    bp1 = 1.0 / jnp.sqrt(hidden_size)
    bp2 = 1.0 / jnp.sqrt(proj_size)
    w_proj = jax.random.uniform(k1, (hidden_size, proj_size), jnp.float32, -bp1, bp1)
    b_proj = jax.random.uniform(k2, (1, proj_size), jnp.float32, -bp1, bp1)
    w_clf = jax.random.uniform(k3, (proj_size, num_labels), jnp.float32, -bp2, bp2)
    b_clf = jax.random.uniform(k4, (1, num_labels), jnp.float32, -bp2, bp2)
    return w_proj, b_proj, w_clf, b_clf


if __name__ == "__main__":
    # Small shapes consistent with the forward pass:
    #   hubert last_hidden_state -> [B, T, H]; projector H->256; classifier 256->L
    B, T, H = 2, 20, 32
    PROJ = 256
    NUM_LABELS = 5

    key = jax.random.PRNGKey(0)
    k_x, k_p = jax.random.split(key)

    hidden_states = jax.random.normal(k_x, (B, T, H), jnp.float32)
    w_proj, b_proj, w_clf, b_clf = init_params(k_p, H, PROJ, NUM_LABELS)

    def reference(hs):
        pooled = jnp.mean(hs.astype(jnp.float32), axis=1)
        return jnp.tanh(pooled @ w_proj + b_proj[0]) @ w_clf + b_clf[0]

    # t_tile=8 forces a 3-step time grid with a partial last tile (rem=4),
    # exercising the tiled accumulation + static-slice partial-tile path.
    logits = model_for_clf_head(hidden_states, w_proj, b_proj, w_clf, b_clf,
                                t_tile=8)
    logits = jax.block_until_ready(logits)
    assert logits.shape == (B, NUM_LABELS)
    assert jnp.allclose(logits, reference(hidden_states), atol=1e-5), \
        "f32 mismatch vs reference"

    # bf16 streaming path (halves HBM bytes of the mem-bound pooling stream);
    # accumulation and the head matmuls stay f32 inside the kernel.
    hs_bf16 = hidden_states.astype(jnp.bfloat16)
    logits_bf16 = jax.block_until_ready(
        model_for_clf_head(hs_bf16, w_proj, b_proj, w_clf, b_clf, t_tile=16))
    assert jnp.allclose(logits_bf16, reference(hs_bf16), atol=1e-2, rtol=1e-2), \
        "bf16 mismatch vs reference"

    # Device-aware auto-tiling path (t_tile / vmem_limit derived from the part).
    logits_auto = jax.block_until_ready(
        model_for_clf_head(hidden_states, w_proj, b_proj, w_clf, b_clf))
    assert jnp.allclose(logits_auto, reference(hidden_states), atol=1e-5), \
        "auto-tiled mismatch vs reference"

    print("KERNEL_OK")
</pallas_src>

<mosaic_0001>
module attributes {stable_mosaic.version = 11 : i64} {
  func.func @clf_head_kernel(%arg0: i32, %arg1: i32, %arg2: memref<2x8x32xf32, #tpu.memory_space<vmem>>, %arg3: memref<32x256xf32, #tpu.memory_space<vmem>>, %arg4: memref<1x256xf32, #tpu.memory_space<vmem>>, %arg5: memref<256x128xf32, #tpu.memory_space<vmem>>, %arg6: memref<1x128xf32, #tpu.memory_space<vmem>>, %arg7: memref<2x128xf32, #tpu.memory_space<vmem>>, %arg8: memref<2x32xf32, #tpu.memory_space<vmem>>) attributes {dimension_semantics = [#tpu.dimension_semantics<parallel>, #tpu.dimension_semantics<arbitrary>], iteration_bounds = array<i64: 1, 3>, scalar_prefetch = 0 : i64, scratch_operands = 1 : i64, tpu.core_type = #tpu.core_type<tc>, window_params = [{pipeline_mode = #tpu.pipeline_mode<double_buffered>, transform_indices = @transform_0, window_bounds = array<i64: 2, 8, 32>}, {pipeline_mode = #tpu.pipeline_mode<synchronous>, transform_indices = @transform_1, window_bounds = array<i64: 32, 256>}, {pipeline_mode = #tpu.pipeline_mode<synchronous>, transform_indices = @transform_2, window_bounds = array<i64: 1, 256>}, {pipeline_mode = #tpu.pipeline_mode<synchronous>, transform_indices = @transform_3, window_bounds = array<i64: 256, 128>}, {pipeline_mode = #tpu.pipeline_mode<synchronous>, transform_indices = @transform_4, window_bounds = array<i64: 1, 128>}, {transform_indices = @transform_5, window_bounds = array<i64: 2, 128>}]} {
    %c0_i32 = arith.constant 0 : i32
    %0 = arith.cmpi eq, %arg1, %c0_i32 : i32
    %1 = arith.extui %0 : i1 to i32
    %c0_i32_0 = arith.constant 0 : i32
    %2 = arith.cmpi ne, %1, %c0_i32_0 : i32
    scf.if %2 {
      %cst = arith.constant 0.000000e+00 : f32
      %12 = vector.broadcast %cst : f32 to vector<2x32xf32>
      %c0 = arith.constant 0 : index
      %c0_6 = arith.constant 0 : index
      %13 = vector.load %arg8[%c0, %c0_6] : memref<2x32xf32, #tpu.memory_space<vmem>>, vector<2x32xf32>
      tpu.vector_store %arg8[%c0, %c0_6], %12 {strides = array<i32>} : memref<2x32xf32, #tpu.memory_space<vmem>>, vector<2x32xf32>,
    } else {
    }
    %c2_i32 = arith.constant 2 : i32
    %3 = arith.cmpi ne, %arg1, %c2_i32 : i32
    %4 = arith.extui %3 : i1 to i32
    %c0_i32_1 = arith.constant 0 : i32
    %5 = arith.cmpi ne, %4, %c0_i32_1 : i32
    scf.if %5 {
      %c0 = arith.constant 0 : index
      %c0_6 = arith.constant 0 : index
      %12 = vector.load %arg8[%c0, %c0_6] : memref<2x32xf32, #tpu.memory_space<vmem>>, vector<2x32xf32>
      %c0_7 = arith.constant 0 : index
      %c0_8 = arith.constant 0 : index
      %c0_9 = arith.constant 0 : index
      %13 = vector.load %arg2[%c0_7, %c0_8, %c0_9] : memref<2x8x32xf32, #tpu.memory_space<vmem>>, vector<2x8x32xf32>
      %cst = arith.constant dense<0.000000e+00> : vector<2x32xf32>
      %14 = vector.multi_reduction <add>, %13, %cst [1] : vector<2x8x32xf32> to vector<2x32xf32>
      %15 = arith.addf %12, %14 : vector<2x32xf32>
      %c0_10 = arith.constant 0 : index
      %c0_11 = arith.constant 0 : index
      %16 = vector.load %arg8[%c0_10, %c0_11] : memref<2x32xf32, #tpu.memory_space<vmem>>, vector<2x32xf32>
      tpu.vector_store %arg8[%c0_10, %c0_11], %15 {strides = array<i32>} : memref<2x32xf32, #tpu.memory_space<vmem>>, vector<2x32xf32>,
    } else {
    }
    %c2_i32_2 = arith.constant 2 : i32
    %6 = arith.cmpi eq, %arg1, %c2_i32_2 : i32
    %7 = arith.extui %6 : i1 to i32
    %c0_i32_3 = arith.constant 0 : i32
    %8 = arith.cmpi ne, %7, %c0_i32_3 : i32
    scf.if %8 {
      %c0 = arith.constant 0 : index
      %c0_6 = arith.constant 0 : index
      %12 = vector.load %arg8[%c0, %c0_6] : memref<2x32xf32, #tpu.memory_space<vmem>>, vector<2x32xf32>
      %c0_7 = arith.constant 0 : index
      %c0_8 = arith.constant 0 : index
      %c0_9 = arith.constant 0 : index
      %13 = vector.load %arg2[%c0_7, %c0_8, %c0_9] : memref<2x8x32xf32, #tpu.memory_space<vmem>>, vector<2x4x32xf32>
      %cst = arith.constant dense<0.000000e+00> : vector<2x32xf32>
      %14 = vector.multi_reduction <add>, %13, %cst [1] : vector<2x4x32xf32> to vector<2x32xf32>
      %15 = arith.addf %12, %14 : vector<2x32xf32>
      %c0_10 = arith.constant 0 : index
      %c0_11 = arith.constant 0 : index
      %16 = vector.load %arg8[%c0_10, %c0_11] : memref<2x32xf32, #tpu.memory_space<vmem>>, vector<2x32xf32>
      tpu.vector_store %arg8[%c0_10, %c0_11], %15 {strides = array<i32>} : memref<2x32xf32, #tpu.memory_space<vmem>>, vector<2x32xf32>,
    } else {
    }
    %c2_i32_4 = arith.constant 2 : i32
    %9 = arith.cmpi eq, %arg1, %c2_i32_4 : i32
    %10 = arith.extui %9 : i1 to i32
    %c0_i32_5 = arith.constant 0 : i32
    %11 = arith.cmpi ne, %10, %c0_i32_5 : i32
    scf.if %11 {
      %c0 = arith.constant 0 : index
      %c0_6 = arith.constant 0 : index
      %12 = vector.load %arg8[%c0, %c0_6] : memref<2x32xf32, #tpu.memory_space<vmem>>, vector<2x32xf32>
      %cst = arith.constant 5.000000e-02 : f32
      %13 = vector.broadcast %cst : f32 to vector<2x32xf32>
      %14 = arith.mulf %12, %13 : vector<2x32xf32>
      %c0_7 = arith.constant 0 : index
      %c0_8 = arith.constant 0 : index
      %15 = vector.load %arg3[%c0_7, %c0_8] : memref<32x256xf32, #tpu.memory_space<vmem>>, vector<32x256xf32>
      %cst_9 = arith.constant dense<0.000000e+00> : vector<2x256xf32>
      %16 = tpu.matmul %14, %15, %cst_9 {dimension_numbers = #tpu.dot_dimension_numbers<[1], [0], [0], [1], [0, 0, 1, 1], [], []>} : vector<2x32xf32>, vector<32x256xf32>, vector<2x256xf32> -> vector<2x256xf32>
      %c0_10 = arith.constant 0 : index
      %c0_11 = arith.constant 0 : index
      %17 = vector.load %arg4[%c0_10, %c0_11] : memref<1x256xf32, #tpu.memory_space<vmem>>, vector<1x256xf32>
      %18 = vector.broadcast %17 : vector<1x256xf32> to vector<2x256xf32>
      %19 = arith.addf %16, %18 : vector<2x256xf32>
      %20 = math.tanh %19 : vector<2x256xf32>
      %c0_12 = arith.constant 0 : index
      %c0_13 = arith.constant 0 : index
      %21 = vector.load %arg5[%c0_12, %c0_13] : memref<256x128xf32, #tpu.memory_space<vmem>>, vector<256x128xf32>
      %cst_14 = arith.constant dense<0.000000e+00> : vector<2x128xf32>
      %22 = tpu.matmul %20, %21, %cst_14 {dimension_numbers = #tpu.dot_dimension_numbers<[1], [0], [0], [1], [0, 0, 1, 1], [], []>} : vector<2x256xf32>, vector<256x128xf32>, vector<2x128xf32> -> vector<2x128xf32>
      %c0_15 = arith.constant 0 : index
      %c0_16 = arith.constant 0 : index
      %23 = vector.load %arg6[%c0_15, %c0_16] : memref<1x128xf32, #tpu.memory_space<vmem>>, vector<1x128xf32>
      %24 = vector.broadcast %23 : vector<1x128xf32> to vector<2x128xf32>
      %25 = arith.addf %22, %24 : vector<2x128xf32>
      %c0_17 = arith.constant 0 : index
      %c0_18 = arith.constant 0 : index
      %26 = vector.load %arg7[%c0_17, %c0_18] : memref<2x128xf32, #tpu.memory_space<vmem>>, vector<2x128xf32>
      tpu.vector_store %arg7[%c0_17, %c0_18], %25 {strides = array<i32>} : memref<2x128xf32, #tpu.memory_space<vmem>>, vector<2x128xf32>,
    } else {
    }
    return
  }
  func.func @transform_0(%arg0: i32, %arg1: i32) -> (i32, i32, i32) {
    %c0_i32 = arith.constant 0 : i32
    %c0_i32_0 = arith.constant 0 : i32
    return %arg0, %arg1, %c0_i32 : i32, i32, i32
  }
  func.func @transform_1(%arg0: i32, %arg1: i32) -> (i32, i32) {
    %c0_i32 = arith.constant 0 : i32
    %c0_i32_0 = arith.constant 0 : i32
    %c0_i32_1 = arith.constant 0 : i32
    return %c0_i32, %c0_i32_0 : i32, i32
  }
  func.func @transform_2(%arg0: i32, %arg1: i32) -> (i32, i32) {
    %c0_i32 = arith.constant 0 : i32
    %c0_i32_0 = arith.constant 0 : i32
    %c0_i32_1 = arith.constant 0 : i32
    return %c0_i32, %c0_i32_0 : i32, i32
  }
  func.func @transform_3(%arg0: i32, %arg1: i32) -> (i32, i32) {
    %c0_i32 = arith.constant 0 : i32
    %c0_i32_0 = arith.constant 0 : i32
    %c0_i32_1 = arith.constant 0 : i32
    return %c0_i32, %c0_i32_0 : i32, i32
  }
  func.func @transform_4(%arg0: i32, %arg1: i32) -> (i32, i32) {
    %c0_i32 = arith.constant 0 : i32
    %c0_i32_0 = arith.constant 0 : i32
    %c0_i32_1 = arith.constant 0 : i32
    return %c0_i32, %c0_i32_0 : i32, i32
  }
  func.func @transform_5(%arg0: i32, %arg1: i32) -> (i32, i32) {
    %c0_i32 = arith.constant 0 : i32
    %c0_i32_0 = arith.constant 0 : i32
    return %arg0, %c0_i32 : i32, i32
  }
}

module attributes {stable_mosaic.version = 11 : i64} {
  func.func @clf_head_kernel(%arg0: i32, %arg1: i32, %arg2: memref<2x8x32xf32, #tpu.memory_space<vmem>>, %arg3: memref<32x256xf32, #tpu.memory_space<vmem>>, %arg4: memref<1x256xf32, #tpu.memory_space<vmem>>, %arg5: memref<256x128xf32, #tpu.memory_space<vmem>>, %arg6: memref<1x128xf32, #tpu.memory_space<vmem>>, %arg7: memref<2x128xf32, #tpu.memory_space<vmem>>, %arg8: memref<2x32xf32, #tpu.memory_space<vmem>>) attributes {dimension_semantics = [#tpu.dimension_semantics<parallel>, #tpu.dimension_semantics<arbitrary>], iteration_bounds = array<i64: 1, 3>, scalar_prefetch = 0 : i64, scratch_operands = 1 : i64, tpu.core_type = #tpu.core_type<tc>, window_params = [{transform_indices = @transform_0, window_bounds = array<i64: 2, 8, 32>}, {pipeline_mode = #tpu.pipeline_mode<synchronous>, transform_indices = @transform_1, window_bounds = array<i64: 32, 256>}, {pipeline_mode = #tpu.pipeline_mode<synchronous>, transform_indices = @transform_2, window_bounds = array<i64: 1, 256>}, {pipeline_mode = #tpu.pipeline_mode<synchronous>, transform_indices = @transform_3, window_bounds = array<i64: 256, 128>}, {pipeline_mode = #tpu.pipeline_mode<synchronous>, transform_indices = @transform_4, window_bounds = array<i64: 1, 128>}, {transform_indices = @transform_5, window_bounds = array<i64: 2, 128>}]} {
    %c0_i32 = arith.constant 0 : i32
    %0 = arith.cmpi eq, %arg1, %c0_i32 : i32
    %1 = arith.extui %0 : i1 to i32
    %c0_i32_0 = arith.constant 0 : i32
    %2 = arith.cmpi ne, %1, %c0_i32_0 : i32
    scf.if %2 {
      %cst = arith.constant 0.000000e+00 : f32
      %12 = vector.broadcast %cst : f32 to vector<2x32xf32>
      %c0 = arith.constant 0 : index
      %c0_6 = arith.constant 0 : index
      %13 = vector.load %arg8[%c0, %c0_6] : memref<2x32xf32, #tpu.memory_space<vmem>>, vector<2x32xf32>
      tpu.vector_store %arg8[%c0, %c0_6], %12 {strides = array<i32>} : memref<2x32xf32, #tpu.memory_space<vmem>>, vector<2x32xf32>,
    } else {
    }
    %c2_i32 = arith.constant 2 : i32
    %3 = arith.cmpi ne, %arg1, %c2_i32 : i32
    %4 = arith.extui %3 : i1 to i32
    %c0_i32_1 = arith.constant 0 : i32
    %5 = arith.cmpi ne, %4, %c0_i32_1 : i32
    scf.if %5 {
      %c0 = arith.constant 0 : index
      %c0_6 = arith.constant 0 : index
      %12 = vector.load %arg8[%c0, %c0_6] : memref<2x32xf32, #tpu.memory_space<vmem>>, vector<2x32xf32>
      %c0_7 = arith.constant 0 : index
      %c0_8 = arith.constant 0 : index
      %c0_9 = arith.constant 0 : index
      %13 = vector.load %arg2[%c0_7, %c0_8, %c0_9] : memref<2x8x32xf32, #tpu.memory_space<vmem>>, vector<2x8x32xf32>
      %cst = arith.constant dense<0.000000e+00> : vector<2x32xf32>
      %14 = vector.multi_reduction <add>, %13, %cst [1] : vector<2x8x32xf32> to vector<2x32xf32>
      %15 = arith.addf %12, %14 : vector<2x32xf32>
      %c0_10 = arith.constant 0 : index
      %c0_11 = arith.constant 0 : index
      %16 = vector.load %arg8[%c0_10, %c0_11] : memref<2x32xf32, #tpu.memory_space<vmem>>, vector<2x32xf32>
      tpu.vector_store %arg8[%c0_10, %c0_11], %15 {strides = array<i32>} : memref<2x32xf32, #tpu.memory_space<vmem>>, vector<2x32xf32>,
    } else {
    }
    %c2_i32_2 = arith.constant 2 : i32
    %6 = arith.cmpi eq, %arg1, %c2_i32_2 : i32
    %7 = arith.extui %6 : i1 to i32
    %c0_i32_3 = arith.constant 0 : i32
    %8 = arith.cmpi ne, %7, %c0_i32_3 : i32
    scf.if %8 {
      %c0 = arith.constant 0 : index
      %c0_6 = arith.constant 0 : index
      %12 = vector.load %arg8[%c0, %c0_6] : memref<2x32xf32, #tpu.memory_space<vmem>>, vector<2x32xf32>
      %c0_7 = arith.constant 0 : index
      %c0_8 = arith.constant 0 : index
      %c0_9 = arith.constant 0 : index
      %13 = vector.load %arg2[%c0_7, %c0_8, %c0_9] : memref<2x8x32xf32, #tpu.memory_space<vmem>>, vector<2x4x32xf32>
      %cst = arith.constant dense<0.000000e+00> : vector<2x32xf32>
      %14 = vector.multi_reduction <add>, %13, %cst [1] : vector<2x4x32xf32> to vector<2x32xf32>
      %15 = arith.addf %12, %14 : vector<2x32xf32>
      %c0_10 = arith.constant 0 : index
      %c0_11 = arith.constant 0 : index
      %16 = vector.load %arg8[%c0_10, %c0_11] : memref<2x32xf32, #tpu.memory_space<vmem>>, vector<2x32xf32>
      tpu.vector_store %arg8[%c0_10, %c0_11], %15 {strides = array<i32>} : memref<2x32xf32, #tpu.memory_space<vmem>>, vector<2x32xf32>,
    } else {
    }
    %c2_i32_4 = arith.constant 2 : i32
    %9 = arith.cmpi eq, %arg1, %c2_i32_4 : i32
    %10 = arith.extui %9 : i1 to i32
    %c0_i32_5 = arith.constant 0 : i32
    %11 = arith.cmpi ne, %10, %c0_i32_5 : i32
    scf.if %11 {
      %c0 = arith.constant 0 : index
      %c0_6 = arith.constant 0 : index
      %12 = vector.load %arg8[%c0, %c0_6] : memref<2x32xf32, #tpu.memory_space<vmem>>, vector<2x32xf32>
      %cst = arith.constant 5.000000e-02 : f32
      %13 = vector.broadcast %cst : f32 to vector<2x32xf32>
      %14 = arith.mulf %12, %13 : vector<2x32xf32>
      %c0_7 = arith.constant 0 : index
      %c0_8 = arith.constant 0 : index
      %15 = vector.load %arg3[%c0_7, %c0_8] : memref<32x256xf32, #tpu.memory_space<vmem>>, vector<32x256xf32>
      %cst_9 = arith.constant dense<0.000000e+00> : vector<2x256xf32>
      %16 = tpu.matmul %14, %15, %cst_9 {dimension_numbers = #tpu.dot_dimension_numbers<[1], [0], [0], [1], [0, 0, 1, 1], [], []>} : vector<2x32xf32>, vector<32x256xf32>, vector<2x256xf32> -> vector<2x256xf32>
      %c0_10 = arith.constant 0 : index
      %c0_11 = arith.constant 0 : index
      %17 = vector.load %arg4[%c0_10, %c0_11] : memref<1x256xf32, #tpu.memory_space<vmem>>, vector<1x256xf32>
      %18 = vector.broadcast %17 : vector<1x256xf32> to vector<2x256xf32>
      %19 = arith.addf %16, %18 : vector<2x256xf32>
      %20 = math.tanh %19 : vector<2x256xf32>
      %c0_12 = arith.constant 0 : index
      %c0_13 = arith.constant 0 : index
      %21 = vector.load %arg5[%c0_12, %c0_13] : memref<256x128xf32, #tpu.memory_space<vmem>>, vector<256x128xf32>
      %cst_14 = arith.constant dense<0.000000e+00> : vector<2x128xf32>
      %22 = tpu.matmul %20, %21, %cst_14 {dimension_numbers = #tpu.dot_dimension_numbers<[1], [0], [0], [1], [0, 0, 1, 1], [], []>} : vector<2x256xf32>, vector<256x128xf32>, vector<2x128xf32> -> vector<2x128xf32>
      %c0_15 = arith.constant 0 : index
      %c0_16 = arith.constant 0 : index
      %23 = vector.load %arg6[%c0_15, %c0_16] : memref<1x128xf32, #tpu.memory_space<vmem>>, vector<1x128xf32>
      %24 = vector.broadcast %23 : vector<1x128xf32> to vector<2x128xf32>
      %25 = arith.addf %22, %24 : vector<2x128xf32>
      %c0_17 = arith.constant 0 : index
      %c0_18 = arith.constant 0 : index
      %26 = vector.load %arg7[%c0_17, %c0_18] : memref<2x128xf32, #tpu.memory_space<vmem>>, vector<2x128xf32>
      tpu.vector_store %arg7[%c0_17, %c0_18], %25 {strides = array<i32>} : memref<2x128xf32, #tpu.memory_space<vmem>>, vector<2x128xf32>,
    } else {
    }
    return
  }
  func.func @transform_0(%arg0: i32, %arg1: i32) -> (i32, i32, i32) {
    %c0_i32 = arith.constant 0 : i32
    %c0_i32_0 = arith.constant 0 : i32
    return %arg0, %arg1, %c0_i32 : i32, i32, i32
  }
  func.func @transform_1(%arg0: i32, %arg1: i32) -> (i32, i32) {
    %c0_i32 = arith.constant 0 : i32
    %c0_i32_0 = arith.constant 0 : i32
    %c0_i32_1 = arith.constant 0 : i32
    return %c0_i32, %c0_i32_0 : i32, i32
  }
  func.func @transform_2(%arg0: i32, %arg1: i32) -> (i32, i32) {
    %c0_i32 = arith.constant 0 : i32
    %c0_i32_0 = arith.constant 0 : i32
    %c0_i32_1 = arith.constant 0 : i32
    return %c0_i32, %c0_i32_0 : i32, i32
  }
  func.func @transform_3(%arg0: i32, %arg1: i32) -> (i32, i32) {
    %c0_i32 = arith.constant 0 : i32
    %c0_i32_0 = arith.constant 0 : i32
    %c0_i32_1 = arith.constant 0 : i32
    return %c0_i32, %c0_i32_0 : i32, i32
  }
  func.func @transform_4(%arg0: i32, %arg1: i32) -> (i32, i32) {
    %c0_i32 = arith.constant 0 : i32
    %c0_i32_0 = arith.constant 0 : i32
    %c0_i32_1 = arith.constant 0 : i32
    return %c0_i32, %c0_i32_0 : i32, i32
  }
  func.func @transform_5(%arg0: i32, %arg1: i32) -> (i32, i32) {
    %c0_i32 = arith.constant 0 : i32
    %c0_i32_0 = arith.constant 0 : i32
    return %arg0, %c0_i32 : i32, i32
  }
}

</mosaic_0001>

<bundles_post_ra>
// kernel: tpu_custom_call.1
= control target key start
LH: loop header
LB: loop body
LE: loop exit
PB: predicated region body
PF: predicated region fallthrough
CT: control target
= control target key end

     0   :  { %10 = vsyncpa [#allocation5], 0  ;;  %s1113_s0 = inlined_call_operand.vmem [shape: f32[2,20,32], index: 0, kind: input, shape index: {}]   ;;  %s1114_s1 = inlined_call_operand.vmem [shape: f32[32,256], index: 1, kind: input, shape index: {}]   ;;  %s1115_s2 = inlined_call_operand.vmem [shape: f32[1,256], index: 2, kind: input, shape index: {}]   ;;  %s1116_s3 = inlined_call_operand.hbm [shape: f32[256,128], index: 3, kind: input, shape index: {}]   ;;  %s1117_s4 = inlined_call_operand.vmem [shape: f32[1,128], index: 4, kind: input, shape index: {}]   ;;  %s1118_s5 = inlined_call_operand.hbm [shape: f32[2,128], index: 5, kind: output, shape index: {}]  }
   0x1   :  { %11 = vsyncpa [#allocation6], 0  ;;  %s938_s18 = smov 0   ;;  %s940_s19 = smov 0  }
   0x2   :  { %s942_s20 = smov 0   ;;  %s944_s21 = smov 0  }
   0x3   :  { %s946_s22 = smov 0  }
   0x4 LB: > { %s641_s23 = sadd.s32 4294967295, %s900_s22   ;;  %s26_s24 = sadd.s32 1, %s896_s21  ;;  %s900_s22 = sphi %s946_s22, %s17_s22   ;;  %s896_s21 = sphi %s944_s21, %s1133_s21   ;;  %s892_s20 = sphi %s942_s20, %s1132_s20   ;;  %s888_s19 = sphi %s940_s19, %s1131_s19   ;;  %s884_s18 = sphi %s938_s18, %s1130_s18  }
   0x5   : > { %p27_p0 = scmp.ge.s32.totalorder %s26_s24, 3  ;;  %s38_s25 = sadd.s32 1, %s888_s19 }
   0x6   : > { %p45_p1 = scmp.ne.s32.totalorder %s888_s19, %s884_s18  ;;  %p46_p2 = scmp.eq.s32.totalorder %s900_s22, 0 }
   0x7   : > { %s1135_s24 = smov (%p27_p0, %s26_s24), 0  ;;  %p642_p4 = scmp.ge.s32.totalorder %s900_s22, 1 }
   0x8   : > { %p971_p3 = por %p46_p2, %p45_p1  ;;  %s34_s27 = ssub.s32 %s896_s21, %s1135_s24 }
   0x9   : > { %p172_p5 = scmp.lt.s32.totalorder %s900_s22, 4  ;;  %p36_p6 = scmp.eq.s32.totalorder %s34_s27, 0 }
   0xa   : > { %s1122_s26 = scalar_select %p971_p3, 1, 0 }
   0xb   : > { %p979_p7 = pnand %p642_p4, %p172_p5  ;;  %p985_p8 = scmp.eq.s32.totalorder %s641_s23, 0 }
   0xc   : > { %s990_s30 = scalar_select %p36_p6, %s888_s19, %s38_s25  }
   0xd   : > { %s1123_s28 = scalar_select %p979_p7, 1, 0 }
   0xe   : > { %s1124_s29 = scalar_select %p985_p8, 1, 0 }
   0xf   : > { %p742_p9 = pneg %p979_p7  ;;  %s902_s6 = smov [#allocation4]  }
  0x10   : > { %s190_s7 = sshll.u32 %s902_s6, 4  ;;  %s800_s11 = scalar_lea.hbm %s1116_s3, 4096  ;;  %s191_s7 = int_to_ptr.vmem [resolvable:$true] %s190_s7 }
  0x11   : > { %p996_p10 = pnand %p985_p8, %p742_p9  ;;  %p801_p11 = scmp.ne.s32.totalorder %s1116_s3, %s800_s11 }
  0x12   : > { %p807_p1 = scmp.lt.u32.totalorder %s800_s11, %s1116_s3 }
  0x13   : > { %p802_p12 = pneg %p996_p10 }
  0x15   : > { %p803_p13 = pnand %p802_p12, %p801_p11 }
  0x17   : > { %p804_p0 = pneg %p803_p13 }
  0x19   : > { %p809_p2 = pnand %p807_p1, %p804_p0 }
  0x1b   : > { %812 = shalt.err (!%p809_p2)
}
  0x1c   : > { %s813_s16 = scalar_lea.vmem %s191_s7, 4096  ;;  %p821_p9 = scmp.lt.s32.totalorder %s191_s7, %s191_s7 }
  0x1d   : > { %p814_p4 = scmp.ne.s32.totalorder %s191_s7, %s813_s16  ;;  %p822_p8 = scmp.lt.s32.totalorder %s813_s16, %s813_s16 }
  0x1f   : > { %p816_p5 = pnand %p814_p4, %p802_p12  ;;  %p823_p7 = por %p822_p8, %p821_p9 }
  0x21   : > { %p817_p6 = pneg %p816_p5 }
  0x23   : > { %p824_p3 = pnand %p823_p7, %p817_p6 }
  0x25   : > { %827 = shalt.err (!%p824_p3)
}
  0x26   : > { %s903_s17 = smov 128   ;;  %s904_s25 = smov 8  }
  0x27   : > { %745 = dma.hbm_to_vmem [thread:$0]  (!%p996_p10), %s1116_s3, 4096, %s191_s7, [#allocation5], %s903_s17, %s903_s17, %s904_s25  }
  0x28   : > { %p644_p11 = scmp.ge.s32.totalorder %s900_s22, 3 }
  0x29   : > { %p1126_p13 = scmp.ne.s32.totalorder (!%p644_p11), %s1122_s26, 0 }
  0x2a   : > { %203 = sbr.rel (%p644_p11) target bundleno = 56 (0x38), region = 32 }
  0x31   : > { %206 = sbr.rel (!%p1126_p13) target bundleno = 56 (0x38), region = 36  ;;  %s208_s9 = sand.u32 (%p1126_p13), 1, %s888_s19  }
  0x32   : > { %s646_s10 = sshll.u32 (%p1126_p13), %s896_s21, 3  ;;  %s645_s11 = sshll.u32 (%p1126_p13), %s208_s9, 4 }
  0x33   : > { %s215_s14 = scalar_lea.vmem (%p1126_p13), %s1113_s0, %s646_s10  ;;  %s210_s8 = scalar_lea.vmem (%p1126_p13), [#allocation3], %s645_s11 }
  0x34   : > { %v245_v0 = vld [vmem:[%s215_s14] sm:$0xff] (%p1126_p13)  ;;  %v247_v1 = vld [vmem:[%s215_s14 + $0x18] sm:$0xff] (%p1126_p13) }
  0x35   : > { %246 = vst [vmem:[%s210_s8] sm:$0xff] (%p1126_p13), %v245_v0  ;;  %248 = vst [vmem:[%s210_s8 + $0x8] sm:$0xff] (%p1126_p13), %v247_v1 }
  0x38 PF: > { %p1127_p3 = scmp.ne.s32.totalorder %s1123_s28, 0 }
  0x39   : > { %s260_s26 = sand.u32 (!%p1127_p3), 1, %s884_s18   ;;  %p1128_p7 = scmp.ne.s32.totalorder (!%p1127_p3), %s1124_s29, 0 }
  0x3a   : > { %257 = sbr.rel (%p1127_p3) target bundleno = 595 (0x253), region = 74  ;;  %s648_s7 = sshll.u32 (!%p1127_p3), %s260_s26, 4 }
  0x3b   : > { %s1027_s15 = scalar_lea.vmem (!%p1127_p3), [#allocation3], %s648_s7 }
  0x41   : > { %875 = dma.done.wait (%p1128_p7), [#allocation5], 4096  }
  0x42   : > { %877 = vsyncadd (%p1128_p7), [#allocation5], 4294963200  ;;  %p650_p8 = scmp.ne.s32.totalorder %s892_s20, 0 }
  0x43   : > { %vm291_vm0 = vcmask (!%p650_p8), 254976   ;;  %v905_v2 = vmov (!%p650_p8), 0.0  }
  0x44   : > { %290 = sbr.rel (%p650_p8) target bundleno = 75 (0x4b), region = 86  ;;  %292 = vst.msk [vmem:[#allocation2] sm:$0x3] (!%p650_p8), %vm291_vm0, %v905_v2 }
  0x4b PF: > { %p651_p10 = scmp.eq.s32.totalorder %s892_s20, 2 }
  0x4c   : > { %v298_v3 = vld [vmem:[%s1027_s15] sm:$0xff] (!%p651_p10)  ;;  %v299_v4 = vld [vmem:[%s1027_s15 + $0x8] sm:$0xff] (!%p651_p10)  ;;  %vm300_vm1 = vcmask (!%p651_p10), 261120   ;;  %vm317_vm2 = vcmask (!%p651_p10), 1041409   ;;  %vm321_vm3 = vcmask (!%p651_p10), 254976  }
  0x4d   : > { %296 = sbr.rel (%p651_p10) target bundleno = 94 (0x5e), region = 90  ;;  %v301_v5 = vsel (!%p651_p10), %vm300_vm1, %v298_v3, 0.0  ;;  %v308_v6 = vsel (!%p651_p10), %vm300_vm1, %v299_v4, 0.0  ;;  %v297_v17 = vld [vmem:[#allocation2] sm:$0x3] (!%p651_p10) }
  0x4e   : > { %v302_v7 = vrot.slane (!%p651_p10), %v301_v5, 4  ;;  %v309_v8 = vrot.slane (!%p651_p10), %v308_v6, 4 }
  0x50   : > { %v303_v9 = vadd.f32 (!%p651_p10), %v302_v7, %v301_v5  ;;  %v310_v10 = vadd.f32 (!%p651_p10), %v309_v8, %v308_v6 }
  0x52   : > { %v304_v11 = vrot.slane (!%p651_p10), %v303_v9, 2  ;;  %v311_v12 = vrot.slane (!%p651_p10), %v310_v10, 2 }
  0x54   : > { %v305_v13 = vadd.f32 %v304_v11, %v303_v9  ;;  %v312_v14 = vadd.f32 %v311_v12, %v310_v10 }
  0x56   : > { %v306_v15 = vrot.slane %v305_v13, 1  ;;  %v313_v16 = vrot.slane %v312_v14, 1 }
  0x58   : > { %v307_v18 = vadd.f32 %v306_v15, %v305_v13  ;;  %v314_v19 = vadd.f32 %v313_v16, %v312_v14 }
  0x5a   : > { %v318_v20 = vsel %vm317_vm2, %v314_v19, %v307_v18 }
  0x5b   : > { %v320_v21 = vadd.f32 %v318_v20, %v297_v17 }
  0x5d   : > { %322 = vst.msk [vmem:[#allocation2] sm:$0x3] %vm321_vm3, %v320_v21 }
  0x5e PF: > { %p652_p12 = scmp.ne.s32.totalorder %s892_s20, 2 }
  0x5f   : > { %v356_v22 = vld [vmem:[%s1114_s1 + $0x8] sm:$0xff] (!%p652_p12)  ;;  %v358_v23 = vld [vmem:[%s1114_s1 + $0x18] sm:$0xff] (!%p652_p12)  ;;  %v355_v24 = vld [vmem:[%s1114_s1] sm:$0xff] (!%p652_p12)  ;;  %v906_v29 = vmov (!%p652_p12), 0.0   ;;  %vm330_vm4 = vcmask (!%p652_p12), 257024   ;;  %vm347_vm5 = vcmask (!%p652_p12), 1041409  }
  0x60   : > { %326 = sbr.rel (%p652_p12) target bundleno = 570 (0x23a), region = 94  ;;  %v694_v25 = vpack.c.bf16 (!%p652_p12), %v358_v23, %v356_v22  ;;  %v357_v26 = vld [vmem:[%s1114_s1 + $0x10] sm:$0xff] (!%p652_p12)  ;;  %v360_v27 = vld [vmem:[%s1114_s1 + $0x28] sm:$0xff] (!%p652_p12)  ;;  %v362_v28 = vld [vmem:[%s1114_s1 + $0x38] sm:$0xff] (!%p652_p12)  ;;  %443 = vmatprep.mubr.f32.mxu0 (!%p652_p12), %v906_v29  ;;  %vm351_vm6 = vcmask (!%p652_p12), 254976   ;;  %vm375_vm7 = vcmask (!%p652_p12), 261120  }
  0x61   : > { %v696_v30 = vpack.c.bf16 (!%p652_p12), %v357_v26, %v355_v24  ;;  %v698_v31 = vpack.c.bf16 (!%p652_p12), %v362_v28, %v360_v27  ;;  %v359_v32 = vld [vmem:[%s1114_s1 + $0x20] sm:$0xff] (!%p652_p12)  ;;  %v361_v33 = vld [vmem:[%s1114_s1 + $0x30] sm:$0xff] (!%p652_p12)  ;;  %v329_v35 = vld [vmem:[%s1027_s15 + $0x8] sm:$0xf] (!%p652_p12) }
  0x62   : > { %695 = vmatprep.subr.bf16.mxu0 (!%p652_p12), %v694_v25  ;;  %v328_v34 = vld [vmem:[%s1027_s15] sm:$0xf] (!%p652_p12)  ;;  %v700_v37 = vpack.c.bf16 (!%p652_p12), %v361_v33, %v359_v32  ;;  %v338_v39 = vsel (!%p652_p12), %vm330_vm4, %v329_v35, 0.0  ;;  %v469_v40 = vld [vmem:[#allocation4 + $0x88] sm:$0xff] (!%p652_p12)  ;;  %v471_v48 = vld [vmem:[#allocation4 + $0x98] sm:$0xff] (!%p652_p12) }
  0x63   : > { %v468_v36 = vld [vmem:[#allocation4 + $0x80] sm:$0xff] (!%p652_p12)  ;;  %697 = vmatpush1.bf16.msra.mxu0 (!%p652_p12), %v696_v30  ;;  %v331_v38 = vsel (!%p652_p12), %vm330_vm4, %v328_v34, 0.0  ;;  %v453_v42 = vld [vmem:[#allocation4 + $0x8] sm:$0xff] (!%p652_p12)  ;;  %v339_v44 = vrot.slane (!%p652_p12), %v338_v39, 4  ;;  %v470_v47 = vld [vmem:[#allocation4 + $0x90] sm:$0xff] (!%p652_p12) }
  0x64   : > { %v452_v41 = vld [vmem:[#allocation4] sm:$0xff] (!%p652_p12)  ;;  %699 = vmatprep.subr.bf16.mxu0 (!%p652_p12), %v698_v31  ;;  %v332_v43 = vrot.slane (!%p652_p12), %v331_v38, 4  ;;  %v702_v45 = vpack.c.bf16 (!%p652_p12), %v469_v40, %v468_v36  ;;  %v454_v49 = vld [vmem:[#allocation4 + $0x10] sm:$0xff] (!%p652_p12)  ;;  %v706_v50 = vpack.c.bf16 (!%p652_p12), %v471_v48, %v470_v47  ;;  %v455_v51 = vld [vmem:[#allocation4 + $0x18] sm:$0xff] (!%p652_p12)  ;;  %v365_v40 = vlaneseq (!%p652_p12) }
  0x65   : > { %v704_v46 = vpack.c.bf16 (!%p652_p12), %v453_v42, %v452_v41  ;;  %v472_v52 = vld [vmem:[#allocation4 + $0xa0] sm:$0xff] (!%p652_p12)  ;;  %v473_v53 = vld [vmem:[#allocation4 + $0xa8] sm:$0xff] (!%p652_p12)  ;;  %v340_v55 = vadd.f32 (!%p652_p12), %v339_v44, %v338_v39  ;;  %v708_v56 = vpack.c.bf16 (!%p652_p12), %v455_v51, %v454_v49  ;;  %v474_v62 = vld [vmem:[#allocation4 + $0xb0] sm:$0xff] (!%p652_p12) }
  0x66   : > { %v333_v54 = vadd.f32 (!%p652_p12), %v332_v43, %v331_v38  ;;  %703 = vmatprep.subr.bf16.mxu1 (!%p652_p12), %v702_v45  ;;  %v710_v59 = vpack.c.bf16 (!%p652_p12), %v473_v53, %v472_v52  ;;  %v456_v60 = vld [vmem:[#allocation4 + $0x20] sm:$0xff] (!%p652_p12)  ;;  %v457_v61 = vld [vmem:[#allocation4 + $0x28] sm:$0xff] (!%p652_p12)  ;;  %v475_v63 = vld [vmem:[#allocation4 + $0xb8] sm:$0xff] (!%p652_p12)  ;;  %v366_v41 = vshrl.u32 (!%p652_p12), %v365_v40, 7 }
  0x67   : > { %701 = vmatpush1.bf16.msra.mxu0 %v700_v37  ;;  %705 = vmatpush3.bf16.msra.mxu1 %v704_v46  ;;  %v341_v58 = vrot.slane %v340_v55, 2  ;;  %v712_v2 = vpack.c.bf16 %v457_v61, %v456_v60  ;;  %v714_v5 = vpack.c.bf16 %v475_v63, %v474_v62  ;;  %v458_v6 = vld [vmem:[#allocation4 + $0x30] sm:$0xff]  ;;  %v459_v7 = vld [vmem:[#allocation4 + $0x38] sm:$0xff]  ;;  %v476_v16 = vld [vmem:[#allocation4 + $0xc0] sm:$0xff] }
  0x68   : > { %v334_v57 = vrot.slane %v333_v54, 2  ;;  %707 = vmatprep.subr.bf16.mxu1 %v706_v50  ;;  %v327_v8 = vld [vmem:[#allocation2] sm:$0x3]  ;;  %v716_v11 = vpack.c.bf16 %v459_v7, %v458_v6  ;;  %v477_v17 = vld [vmem:[#allocation4 + $0xc8] sm:$0xff]  ;;  %v460_v19 = vld [vmem:[#allocation4 + $0x40] sm:$0xff]  ;;  %v367_v42 = vsub.s32 0, %v366_v41 }
  0x69   : > { %v342_v1 = vadd.f32 %v341_v58, %v340_v55  ;;  %v718_v18 = vpack.c.bf16 %v477_v17, %v476_v16  ;;  %v461_v20 = vld [vmem:[#allocation4 + $0x48] sm:$0xff]  ;;  %v478_v22 = vld [vmem:[#allocation4 + $0xd0] sm:$0xff]  ;;  %v479_v23 = vld [vmem:[#allocation4 + $0xd8] sm:$0xff]  ;;  %v371_v44 = vsub.s32 1, %v366_v41 }
  0x6a   : > { %v335_v0 = vadd.f32 %v334_v57, %v333_v54  ;;  %v720_v21 = vpack.c.bf16 %v461_v20, %v460_v19  ;;  %v722_v24 = vpack.c.bf16 %v479_v23, %v478_v22  ;;  %v462_v25 = vld [vmem:[#allocation4 + $0x50] sm:$0xff]  ;;  %v463_v26 = vld [vmem:[#allocation4 + $0x58] sm:$0xff]  ;;  %v480_v28 = vld [vmem:[#allocation4 + $0xe0] sm:$0xff] }
  0x6b   : > { %709 = vmatpush3.bf16.msra.mxu1 %v708_v56  ;;  %v343_v4 = vrot.slane %v342_v1, 1  ;;  %v724_v27 = vpack.c.bf16 %v463_v26, %v462_v25  ;;  %v481_v29 = vld [vmem:[#allocation4 + $0xe8] sm:$0xff]  ;;  %v464_v30 = vld [vmem:[#allocation4 + $0x60] sm:$0xff]  ;;  %v482_v33 = vld [vmem:[#allocation4 + $0xf0] sm:$0xff] }
  0x6c   : > { %v336_v3 = vrot.slane %v335_v0, 1  ;;  %711 = vmatprep.subr.bf16.mxu1 %v710_v59  ;;  %v726_v31 = vpack.c.bf16 %v481_v29, %v480_v28  ;;  %v465_v32 = vld [vmem:[#allocation4 + $0x68] sm:$0xff]  ;;  %v483_v34 = vld [vmem:[#allocation4 + $0xf8] sm:$0xff]  ;;  %v466_v37 = vld [vmem:[#allocation4 + $0x70] sm:$0xff] }
  0x6d   : > { %v344_v10 = vadd.f32 %v343_v4, %v342_v1  ;;  %v728_v35 = vpack.c.bf16 %v465_v32, %v464_v30  ;;  %v730_v36 = vpack.c.bf16 %v483_v34, %v482_v33  ;;  %v467_v38 = vld [vmem:[#allocation4 + $0x78] sm:$0xff] }
  0x6e   : > { %v337_v9 = vadd.f32 %v336_v3, %v335_v0  ;;  %v732_v39 = vpack.c.bf16 %v467_v38, %v466_v37  ;;  %v363_v43 = vld [vmem:[%s1115_s2] sm:$0x3] }
  0x6f   : > { %713 = vmatpush3.bf16.msra.mxu1 %v712_v2  ;;  %v368_v45 = vrot.slane %v363_v43, %v367_v42  ;;  %v372_v46 = vrot.slane %v363_v43, %v371_v44  ;;  %v654_v54 = vld [vmem:[%s1117_s4] ss:$0 sm:$0xff] }
  0x70   : > { %v348_v12 = vsel %vm347_vm5, %v344_v10, %v337_v9  ;;  %715 = vmatprep.subr.bf16.mxu1 %v714_v5 }
  0x71   : > { %v350_v13 = vadd.f32 %v348_v12, %v327_v8 }
  0x73   : > { %352 = vst.msk [vmem:[#allocation2] sm:$0x3] %vm351_vm6, %v350_v13  ;;  %717 = vmatpush3.bf16.msra.mxu1 %v716_v11 }
  0x74   : > { %719 = vmatprep.subr.bf16.mxu1 %v718_v18 }
  0x77   : > { %721 = vmatpush3.bf16.msra.mxu1 %v720_v21 }
  0x78   : > { %723 = vmatprep.subr.bf16.mxu1 %v722_v24 }
  0x7a   : > { %v353_v14 = vld [vmem:[#allocation2] sm:$0x3] }
  0x7b   : > { %v354_v15 = vmul.f32 0.05, %v353_v14  ;;  %725 = vmatpush3.bf16.msra.mxu1 %v724_v27 }
  0x7c   : > { %727 = vmatprep.subr.bf16.mxu1 %v726_v31 }
  0x7d   : > { %653 = vmatmul.mubr.msk.f32.vlgmr.msra.gmra.mrb[0].mxu0 %vm375_vm7, %v354_v15 }
  0x7f   : > { %729 = vmatpush3.bf16.msra.mxu1 %v728_v35 }
  0x80   : > { %731 = vmatprep.subr.bf16.mxu1 %v730_v36 }
  0x83   : > { %733 = vmatpush3.bf16.msra.mxu1 %v732_v39 }
 0x150   : > { %v445_v47 = vpop.f32.mrb[0].mxu0 }
 0x151   : > { %v446_v48 = vadd.f32 %v445_v47, %v368_v45  ;;  %v447_v49 = vpop.f32.mrb[1].mxu0 }
 0x152   : > { %v448_v50 = vadd.f32 %v447_v49, %v372_v46 }
 0x154   : > { %796 = vtanh.f32 %v448_v50 }
 0x155   : > { %798 = vtanh.f32 %v446_v48 }
 0x15e   : > { %v797_v51 = vpop.eup %796 }
 0x15f   : > { %v799_v52 = vpop.eup %798  ;;  %555 = vmatprep.mubr.f32.mxu1 %v797_v51 }
 0x160   : > { %556 = vmatmul.mubr.f32.vlgmr.msra.gmra.mrb[0].mxu1 %v799_v52 }
 0x233   : > { %v691_v53 = vpop.f32.mrb[0].mxu1 }
 0x234   : > { %v692_v55 = vpop.f32.mrb[1].mxu1 }
 0x235   : > { %v693_v56 = vadd.f32 %v692_v55, %v691_v53 }
 0x237   : > { %v558_v57 = vadd.f32 %v693_v56, %v654_v54 }
 0x239   : > { %561 = vst [vmem:[#allocation7] sm:$0x3] %v558_v57 }
 0x23a PF: > { %p1072_p0 = scmp.eq.s32.totalorder %s641_s23, 2  ;;  %s907_s29 = smov [#allocation7]  }
 0x23b   : > { %s571_s16 = sshll.u32 %s907_s29, 4  ;;  %s572_s16 = int_to_ptr.vmem [resolvable:$true] %s571_s16 }
 0x23c   : > { %s828_s17 = scalar_lea.vmem %s572_s16, 32  ;;  %p835_p5 = scmp.lt.s32.totalorder %s572_s16, %s572_s16 }
 0x23d   : > { %p829_p1 = scmp.ne.s32.totalorder %s572_s16, %s828_s17  ;;  %p836_p6 = scmp.lt.s32.totalorder %s828_s17, %s828_s17 }
 0x23f   : > { %p830_p2 = pnand %p829_p1, %p1072_p0  ;;  %p837_p9 = por %p836_p6, %p835_p5 }
 0x241   : > { %p831_p4 = pneg %p830_p2 }
 0x243   : > { %p838_p11 = pnand %p837_p9, %p831_p4 }
 0x245   : > { %841 = shalt.err (!%p838_p11)
}
 0x246   : > { %s842_s23 = scalar_lea.hbm %s1118_s5, 32 }
 0x247   : > { %p843_p13 = scmp.ne.s32.totalorder %s1118_s5, %s842_s23  ;;  %p848_p8 = scmp.lt.u32.totalorder %s842_s23, %s1118_s5 }
 0x249   : > { %p844_p3 = pnand %p843_p13, %p1072_p0 }
 0x24b   : > { %p845_p7 = pneg %p844_p3 }
 0x24d   : > { %p850_p10 = pnand %p848_p8, %p845_p7 }
 0x24f   : > { %853 = shalt.err (!%p850_p10)
}
 0x250   : > { %739 = dma.vmem_to_hbm [thread:$0]  (%p1072_p0), %s572_s16, 32, %s1118_s5, [#allocation6]  }
 0x251   : > { %879 = dma.done.wait (%p1072_p0), [#allocation6], 32  }
 0x252   : > { %881 = vsyncadd (%p1072_p0), [#allocation6], 4294967264 }
 0x253 PF: > { %s17_s22 = sadd.s32 1, %s900_s22   ;;  %s1130_s18 = smov %s888_s19 }
 0x254   : > { %p14_p12 = scmp.ge.s32.totalorder %s17_s22, 5   ;;  %s1131_s19 = smov %s990_s30 }
 0x255   : > { %s1132_s20 = smov %s896_s21  ;;  %s1133_s21 = smov %s1135_s24 }
 0x256   :  { %16 = sbr.rel (!%p14_p12) target bundleno = 4 (0x4), region = 128 }
 0x25d   :  { %584 = vsyncpa [#allocation5], 1 }
 0x25e   :  { %586 = vsyncpa [#allocation5 + $0x1], 1 }
 0x25f   :  { %587 = vsyncpa [#allocation6], 1 }
 0x260   :  { %589 = vsyncpa [#allocation6 + $0x1], 1 }

// kernel: tpu_custom_call.1
= control target key start
LH: loop header
LB: loop body
LE: loop exit
PB: predicated region body
PF: predicated region fallthrough
CT: control target
= control target key end

     0   :  { %10 = vsyncpa [#allocation5], 0  ;;  %s1113_s0 = inlined_call_operand.vmem [shape: f32[2,20,32], index: 0, kind: input, shape index: {}]   ;;  %s1114_s1 = inlined_call_operand.vmem [shape: f32[32,256], index: 1, kind: input, shape index: {}]   ;;  %s1115_s2 = inlined_call_operand.vmem [shape: f32[1,256], index: 2, kind: input, shape index: {}]   ;;  %s1116_s3 = inlined_call_operand.hbm [shape: f32[256,128], index: 3, kind: input, shape index: {}]   ;;  %s1117_s4 = inlined_call_operand.vmem [shape: f32[1,128], index: 4, kind: input, shape index: {}]   ;;  %s1118_s5 = inlined_call_operand.hbm [shape: f32[2,128], index: 5, kind: output, shape index: {}]  }
   0x1   :  { %11 = vsyncpa [#allocation6], 0  ;;  %s938_s18 = smov 0   ;;  %s940_s19 = smov 0  }
   0x2   :  { %s942_s20 = smov 0   ;;  %s944_s21 = smov 0  }
   0x3   :  { %s946_s22 = smov 0  }
   0x4 LB: > { %s641_s23 = sadd.s32 4294967295, %s900_s22   ;;  %s26_s24 = sadd.s32 1, %s896_s21  ;;  %s900_s22 = sphi %s946_s22, %s17_s22   ;;  %s896_s21 = sphi %s944_s21, %s1133_s21   ;;  %s892_s20 = sphi %s942_s20, %s1132_s20   ;;  %s888_s19 = sphi %s940_s19, %s1131_s19   ;;  %s884_s18 = sphi %s938_s18, %s1130_s18  }
   0x5   : > { %p27_p0 = scmp.ge.s32.totalorder %s26_s24, 3  ;;  %s38_s25 = sadd.s32 1, %s888_s19 }
   0x6   : > { %p45_p1 = scmp.ne.s32.totalorder %s888_s19, %s884_s18  ;;  %p46_p2 = scmp.eq.s32.totalorder %s900_s22, 0 }
   0x7   : > { %s1135_s24 = smov (%p27_p0, %s26_s24), 0  ;;  %p642_p4 = scmp.ge.s32.totalorder %s900_s22, 1 }
   0x8   : > { %p971_p3 = por %p46_p2, %p45_p1  ;;  %s34_s27 = ssub.s32 %s896_s21, %s1135_s24 }
   0x9   : > { %p172_p5 = scmp.lt.s32.totalorder %s900_s22, 4  ;;  %p36_p6 = scmp.eq.s32.totalorder %s34_s27, 0 }
   0xa   : > { %s1122_s26 = scalar_select %p971_p3, 1, 0 }
   0xb   : > { %p979_p7 = pnand %p642_p4, %p172_p5  ;;  %p985_p8 = scmp.eq.s32.totalorder %s641_s23, 0 }
   0xc   : > { %s990_s30 = scalar_select %p36_p6, %s888_s19, %s38_s25  }
   0xd   : > { %s1123_s28 = scalar_select %p979_p7, 1, 0 }
   0xe   : > { %s1124_s29 = scalar_select %p985_p8, 1, 0 }
   0xf   : > { %p742_p9 = pneg %p979_p7  ;;  %s902_s6 = smov [#allocation4]  }
  0x10   : > { %s190_s7 = sshll.u32 %s902_s6, 4  ;;  %s800_s11 = scalar_lea.hbm %s1116_s3, 4096  ;;  %s191_s7 = int_to_ptr.vmem [resolvable:$true] %s190_s7 }
  0x11   : > { %p996_p10 = pnand %p985_p8, %p742_p9  ;;  %p801_p11 = scmp.ne.s32.totalorder %s1116_s3, %s800_s11 }
  0x12   : > { %p807_p1 = scmp.lt.u32.totalorder %s800_s11, %s1116_s3 }
  0x13   : > { %p802_p12 = pneg %p996_p10 }
  0x15   : > { %p803_p13 = pnand %p802_p12, %p801_p11 }
  0x17   : > { %p804_p0 = pneg %p803_p13 }
  0x19   : > { %p809_p2 = pnand %p807_p1, %p804_p0 }
  0x1b   : > { %812 = shalt.err (!%p809_p2)
}
  0x1c   : > { %s813_s16 = scalar_lea.vmem %s191_s7, 4096  ;;  %p821_p9 = scmp.lt.s32.totalorder %s191_s7, %s191_s7 }
  0x1d   : > { %p814_p4 = scmp.ne.s32.totalorder %s191_s7, %s813_s16  ;;  %p822_p8 = scmp.lt.s32.totalorder %s813_s16, %s813_s16 }
  0x1f   : > { %p816_p5 = pnand %p814_p4, %p802_p12  ;;  %p823_p7 = por %p822_p8, %p821_p9 }
  0x21   : > { %p817_p6 = pneg %p816_p5 }
  0x23   : > { %p824_p3 = pnand %p823_p7, %p817_p6 }
  0x25   : > { %827 = shalt.err (!%p824_p3)
}
  0x26   : > { %s903_s17 = smov 128   ;;  %s904_s25 = smov 8  }
  0x27   : > { %745 = dma.hbm_to_vmem [thread:$0]  (!%p996_p10), %s1116_s3, 4096, %s191_s7, [#allocation5], %s903_s17, %s903_s17, %s904_s25  }
  0x28   : > { %p644_p11 = scmp.ge.s32.totalorder %s900_s22, 3 }
  0x29   : > { %p1126_p13 = scmp.ne.s32.totalorder (!%p644_p11), %s1122_s26, 0 }
  0x2a   : > { %203 = sbr.rel (%p644_p11) target bundleno = 56 (0x38), region = 32 }
  0x31   : > { %206 = sbr.rel (!%p1126_p13) target bundleno = 56 (0x38), region = 36  ;;  %s208_s9 = sand.u32 (%p1126_p13), 1, %s888_s19  }
  0x32   : > { %s646_s10 = sshll.u32 (%p1126_p13), %s896_s21, 3  ;;  %s645_s11 = sshll.u32 (%p1126_p13), %s208_s9, 4 }
  0x33   : > { %s215_s14 = scalar_lea.vmem (%p1126_p13), %s1113_s0, %s646_s10  ;;  %s210_s8 = scalar_lea.vmem (%p1126_p13), [#allocation3], %s645_s11 }
  0x34   : > { %v245_v0 = vld [vmem:[%s215_s14] sm:$0xff] (%p1126_p13)  ;;  %v247_v1 = vld [vmem:[%s215_s14 + $0x18] sm:$0xff] (%p1126_p13) }
  0x35   : > { %246 = vst [vmem:[%s210_s8] sm:$0xff] (%p1126_p13), %v245_v0  ;;  %248 = vst [vmem:[%s210_s8 + $0x8] sm:$0xff] (%p1126_p13), %v247_v1 }
  0x38 PF: > { %p1127_p3 = scmp.ne.s32.totalorder %s1123_s28, 0 }
  0x39   : > { %s260_s26 = sand.u32 (!%p1127_p3), 1, %s884_s18   ;;  %p1128_p7 = scmp.ne.s32.totalorder (!%p1127_p3), %s1124_s29, 0 }
  0x3a   : > { %257 = sbr.rel (%p1127_p3) target bundleno = 595 (0x253), region = 74  ;;  %s648_s7 = sshll.u32 (!%p1127_p3), %s260_s26, 4 }
  0x3b   : > { %s1027_s15 = scalar_lea.vmem (!%p1127_p3), [#allocation3], %s648_s7 }
  0x41   : > { %875 = dma.done.wait (%p1128_p7), [#allocation5], 4096  }
  0x42   : > { %877 = vsyncadd (%p1128_p7), [#allocation5], 4294963200  ;;  %p650_p8 = scmp.ne.s32.totalorder %s892_s20, 0 }
  0x43   : > { %vm291_vm0 = vcmask (!%p650_p8), 254976   ;;  %v905_v2 = vmov (!%p650_p8), 0.0  }
  0x44   : > { %290 = sbr.rel (%p650_p8) target bundleno = 75 (0x4b), region = 86  ;;  %292 = vst.msk [vmem:[#allocation2] sm:$0x3] (!%p650_p8), %vm291_vm0, %v905_v2 }
  0x4b PF: > { %p651_p10 = scmp.eq.s32.totalorder %s892_s20, 2 }
  0x4c   : > { %v298_v3 = vld [vmem:[%s1027_s15] sm:$0xff] (!%p651_p10)  ;;  %v299_v4 = vld [vmem:[%s1027_s15 + $0x8] sm:$0xff] (!%p651_p10)  ;;  %vm300_vm1 = vcmask (!%p651_p10), 261120   ;;  %vm317_vm2 = vcmask (!%p651_p10), 1041409   ;;  %vm321_vm3 = vcmask (!%p651_p10), 254976  }
  0x4d   : > { %296 = sbr.rel (%p651_p10) target bundleno = 94 (0x5e), region = 90  ;;  %v301_v5 = vsel (!%p651_p10), %vm300_vm1, %v298_v3, 0.0  ;;  %v308_v6 = vsel (!%p651_p10), %vm300_vm1, %v299_v4, 0.0  ;;  %v297_v17 = vld [vmem:[#allocation2] sm:$0x3] (!%p651_p10) }
  0x4e   : > { %v302_v7 = vrot.slane (!%p651_p10), %v301_v5, 4  ;;  %v309_v8 = vrot.slane (!%p651_p10), %v308_v6, 4 }
  0x50   : > { %v303_v9 = vadd.f32 (!%p651_p10), %v302_v7, %v301_v5  ;;  %v310_v10 = vadd.f32 (!%p651_p10), %v309_v8, %v308_v6 }
  0x52   : > { %v304_v11 = vrot.slane (!%p651_p10), %v303_v9, 2  ;;  %v311_v12 = vrot.slane (!%p651_p10), %v310_v10, 2 }
  0x54   : > { %v305_v13 = vadd.f32 %v304_v11, %v303_v9  ;;  %v312_v14 = vadd.f32 %v311_v12, %v310_v10 }
  0x56   : > { %v306_v15 = vrot.slane %v305_v13, 1  ;;  %v313_v16 = vrot.slane %v312_v14, 1 }
  0x58   : > { %v307_v18 = vadd.f32 %v306_v15, %v305_v13  ;;  %v314_v19 = vadd.f32 %v313_v16, %v312_v14 }
  0x5a   : > { %v318_v20 = vsel %vm317_vm2, %v314_v19, %v307_v18 }
  0x5b   : > { %v320_v21 = vadd.f32 %v318_v20, %v297_v17 }
  0x5d   : > { %322 = vst.msk [vmem:[#allocation2] sm:$0x3] %vm321_vm3, %v320_v21 }
  0x5e PF: > { %p652_p12 = scmp.ne.s32.totalorder %s892_s20, 2 }
  0x5f   : > { %v356_v22 = vld [vmem:[%s1114_s1 + $0x8] sm:$0xff] (!%p652_p12)  ;;  %v358_v23 = vld [vmem:[%s1114_s1 + $0x18] sm:$0xff] (!%p652_p12)  ;;  %v355_v24 = vld [vmem:[%s1114_s1] sm:$0xff] (!%p652_p12)  ;;  %v906_v29 = vmov (!%p652_p12), 0.0   ;;  %vm330_vm4 = vcmask (!%p652_p12), 257024   ;;  %vm347_vm5 = vcmask (!%p652_p12), 1041409  }
  0x60   : > { %326 = sbr.rel (%p652_p12) target bundleno = 570 (0x23a), region = 94  ;;  %v694_v25 = vpack.c.bf16 (!%p652_p12), %v358_v23, %v356_v22  ;;  %v357_v26 = vld [vmem:[%s1114_s1 + $0x10] sm:$0xff] (!%p652_p12)  ;;  %v360_v27 = vld [vmem:[%s1114_s1 + $0x28] sm:$0xff] (!%p652_p12)  ;;  %v362_v28 = vld [vmem:[%s1114_s1 + $0x38] sm:$0xff] (!%p652_p12)  ;;  %443 = vmatprep.mubr.f32.mxu0 (!%p652_p12), %v906_v29  ;;  %vm351_vm6 = vcmask (!%p652_p12), 254976   ;;  %vm375_vm7 = vcmask (!%p652_p12), 261120  }
  0x61   : > { %v696_v30 = vpack.c.bf16 (!%p652_p12), %v357_v26, %v355_v24  ;;  %v698_v31 = vpack.c.bf16 (!%p652_p12), %v362_v28, %v360_v27  ;;  %v359_v32 = vld [vmem:[%s1114_s1 + $0x20] sm:$0xff] (!%p652_p12)  ;;  %v361_v33 = vld [vmem:[%s1114_s1 + $0x30] sm:$0xff] (!%p652_p12)  ;;  %v329_v35 = vld [vmem:[%s1027_s15 + $0x8] sm:$0xf] (!%p652_p12) }
  0x62   : > { %695 = vmatprep.subr.bf16.mxu0 (!%p652_p12), %v694_v25  ;;  %v328_v34 = vld [vmem:[%s1027_s15] sm:$0xf] (!%p652_p12)  ;;  %v700_v37 = vpack.c.bf16 (!%p652_p12), %v361_v33, %v359_v32  ;;  %v338_v39 = vsel (!%p652_p12), %vm330_vm4, %v329_v35, 0.0  ;;  %v469_v40 = vld [vmem:[#allocation4 + $0x88] sm:$0xff] (!%p652_p12)  ;;  %v471_v48 = vld [vmem:[#allocation4 + $0x98] sm:$0xff] (!%p652_p12) }
  0x63   : > { %v468_v36 = vld [vmem:[#allocation4 + $0x80] sm:$0xff] (!%p652_p12)  ;;  %697 = vmatpush1.bf16.msra.mxu0 (!%p652_p12), %v696_v30  ;;  %v331_v38 = vsel (!%p652_p12), %vm330_vm4, %v328_v34, 0.0  ;;  %v453_v42 = vld [vmem:[#allocation4 + $0x8] sm:$0xff] (!%p652_p12)  ;;  %v339_v44 = vrot.slane (!%p652_p12), %v338_v39, 4  ;;  %v470_v47 = vld [vmem:[#allocation4 + $0x90] sm:$0xff] (!%p652_p12) }
  0x64   : > { %v452_v41 = vld [vmem:[#allocation4] sm:$0xff] (!%p652_p12)  ;;  %699 = vmatprep.subr.bf16.mxu0 (!%p652_p12), %v698_v31  ;;  %v332_v43 = vrot.slane (!%p652_p12), %v331_v38, 4  ;;  %v702_v45 = vpack.c.bf16 (!%p652_p12), %v469_v40, %v468_v36  ;;  %v454_v49 = vld [vmem:[#allocation4 + $0x10] sm:$0xff] (!%p652_p12)  ;;  %v706_v50 = vpack.c.bf16 (!%p652_p12), %v471_v48, %v470_v47  ;;  %v455_v51 = vld [vmem:[#allocation4 + $0x18] sm:$0xff] (!%p652_p12)  ;;  %v365_v40 = vlaneseq (!%p652_p12) }
  0x65   : > { %v704_v46 = vpack.c.bf16 (!%p652_p12), %v453_v42, %v452_v41  ;;  %v472_v52 = vld [vmem:[#allocation4 + $0xa0] sm:$0xff] (!%p652_p12)  ;;  %v473_v53 = vld [vmem:[#allocation4 + $0xa8] sm:$0xff] (!%p652_p12)  ;;  %v340_v55 = vadd.f32 (!%p652_p12), %v339_v44, %v338_v39  ;;  %v708_v56 = vpack.c.bf16 (!%p652_p12), %v455_v51, %v454_v49  ;;  %v474_v62 = vld [vmem:[#allocation4 + $0xb0] sm:$0xff] (!%p652_p12) }
  0x66   : > { %v333_v54 = vadd.f32 (!%p652_p12), %v332_v43, %v331_v38  ;;  %703 = vmatprep.subr.bf16.mxu1 (!%p652_p12), %v702_v45  ;;  %v710_v59 = vpack.c.bf16 (!%p652_p12), %v473_v53, %v472_v52  ;;  %v456_v60 = vld [vmem:[#allocation4 + $0x20] sm:$0xff] (!%p652_p12)  ;;  %v457_v61 = vld [vmem:[#allocation4 + $0x28] sm:$0xff] (!%p652_p12)  ;;  %v475_v63 = vld [vmem:[#allocation4 + $0xb8] sm:$0xff] (!%p652_p12)  ;;  %v366_v41 = vshrl.u32 (!%p652_p12), %v365_v40, 7 }
  0x67   : > { %701 = vmatpush1.bf16.msra.mxu0 %v700_v37  ;;  %705 = vmatpush3.bf16.msra.mxu1 %v704_v46  ;;  %v341_v58 = vrot.slane %v340_v55, 2  ;;  %v712_v2 = vpack.c.bf16 %v457_v61, %v456_v60  ;;  %v714_v5 = vpack.c.bf16 %v475_v63, %v474_v62  ;;  %v458_v6 = vld [vmem:[#allocation4 + $0x30] sm:$0xff]  ;;  %v459_v7 = vld [vmem:[#allocation4 + $0x38] sm:$0xff]  ;;  %v476_v16 = vld [vmem:[#allocation4 + $0xc0] sm:$0xff] }
  0x68   : > { %v334_v57 = vrot.slane %v333_v54, 2  ;;  %707 = vmatprep.subr.bf16.mxu1 %v706_v50  ;;  %v327_v8 = vld [vmem:[#allocation2] sm:$0x3]  ;;  %v716_v11 = vpack.c.bf16 %v459_v7, %v458_v6  ;;  %v477_v17 = vld [vmem:[#allocation4 + $0xc8] sm:$0xff]  ;;  %v460_v19 = vld [vmem:[#allocation4 + $0x40] sm:$0xff]  ;;  %v367_v42 = vsub.s32 0, %v366_v41 }
  0x69   : > { %v342_v1 = vadd.f32 %v341_v58, %v340_v55  ;;  %v718_v18 = vpack.c.bf16 %v477_v17, %v476_v16  ;;  %v461_v20 = vld [vmem:[#allocation4 + $0x48] sm:$0xff]  ;;  %v478_v22 = vld [vmem:[#allocation4 + $0xd0] sm:$0xff]  ;;  %v479_v23 = vld [vmem:[#allocation4 + $0xd8] sm:$0xff]  ;;  %v371_v44 = vsub.s32 1, %v366_v41 }
  0x6a   : > { %v335_v0 = vadd.f32 %v334_v57, %v333_v54  ;;  %v720_v21 = vpack.c.bf16 %v461_v20, %v460_v19  ;;  %v722_v24 = vpack.c.bf16 %v479_v23, %v478_v22  ;;  %v462_v25 = vld [vmem:[#allocation4 + $0x50] sm:$0xff]  ;;  %v463_v26 = vld [vmem:[#allocation4 + $0x58] sm:$0xff]  ;;  %v480_v28 = vld [vmem:[#allocation4 + $0xe0] sm:$0xff] }
  0x6b   : > { %709 = vmatpush3.bf16.msra.mxu1 %v708_v56  ;;  %v343_v4 = vrot.slane %v342_v1, 1  ;;  %v724_v27 = vpack.c.bf16 %v463_v26, %v462_v25  ;;  %v481_v29 = vld [vmem:[#allocation4 + $0xe8] sm:$0xff]  ;;  %v464_v30 = vld [vmem:[#allocation4 + $0x60] sm:$0xff]  ;;  %v482_v33 = vld [vmem:[#allocation4 + $0xf0] sm:$0xff] }
  0x6c   : > { %v336_v3 = vrot.slane %v335_v0, 1  ;;  %711 = vmatprep.subr.bf16.mxu1 %v710_v59  ;;  %v726_v31 = vpack.c.bf16 %v481_v29, %v480_v28  ;;  %v465_v32 = vld [vmem:[#allocation4 + $0x68] sm:$0xff]  ;;  %v483_v34 = vld [vmem:[#allocation4 + $0xf8] sm:$0xff]  ;;  %v466_v37 = vld [vmem:[#allocation4 + $0x70] sm:$0xff] }
  0x6d   : > { %v344_v10 = vadd.f32 %v343_v4, %v342_v1  ;;  %v728_v35 = vpack.c.bf16 %v465_v32, %v464_v30  ;;  %v730_v36 = vpack.c.bf16 %v483_v34, %v482_v33  ;;  %v467_v38 = vld [vmem:[#allocation4 + $0x78] sm:$0xff] }
  0x6e   : > { %v337_v9 = vadd.f32 %v336_v3, %v335_v0  ;;  %v732_v39 = vpack.c.bf16 %v467_v38, %v466_v37  ;;  %v363_v43 = vld [vmem:[%s1115_s2] sm:$0x3] }
  0x6f   : > { %713 = vmatpush3.bf16.msra.mxu1 %v712_v2  ;;  %v368_v45 = vrot.slane %v363_v43, %v367_v42  ;;  %v372_v46 = vrot.slane %v363_v43, %v371_v44  ;;  %v654_v54 = vld [vmem:[%s1117_s4] ss:$0 sm:$0xff] }
  0x70   : > { %v348_v12 = vsel %vm347_vm5, %v344_v10, %v337_v9  ;;  %715 = vmatprep.subr.bf16.mxu1 %v714_v5 }
  0x71   : > { %v350_v13 = vadd.f32 %v348_v12, %v327_v8 }
  0x73   : > { %352 = vst.msk [vmem:[#allocation2] sm:$0x3] %vm351_vm6, %v350_v13  ;;  %717 = vmatpush3.bf16.msra.mxu1 %v716_v11 }
  0x74   : > { %719 = vmatprep.subr.bf16.mxu1 %v718_v18 }
  0x77   : > { %721 = vmatpush3.bf16.msra.mxu1 %v720_v21 }
  0x78   : > { %723 = vmatprep.subr.bf16.mxu1 %v722_v24 }
  0x7a   : > { %v353_v14 = vld [vmem:[#allocation2] sm:$0x3] }
  0x7b   : > { %v354_v15 = vmul.f32 0.05, %v353_v14  ;;  %725 = vmatpush3.bf16.msra.mxu1 %v724_v27 }
  0x7c   : > { %727 = vmatprep.subr.bf16.mxu1 %v726_v31 }
  0x7d   : > { %653 = vmatmul.mubr.msk.f32.vlgmr.msra.gmra.mrb[0].mxu0 %vm375_vm7, %v354_v15 }
  0x7f   : > { %729 = vmatpush3.bf16.msra.mxu1 %v728_v35 }
  0x80   : > { %731 = vmatprep.subr.bf16.mxu1 %v730_v36 }
  0x83   : > { %733 = vmatpush3.bf16.msra.mxu1 %v732_v39 }
 0x150   : > { %v445_v47 = vpop.f32.mrb[0].mxu0 }
 0x151   : > { %v446_v48 = vadd.f32 %v445_v47, %v368_v45  ;;  %v447_v49 = vpop.f32.mrb[1].mxu0 }
 0x152   : > { %v448_v50 = vadd.f32 %v447_v49, %v372_v46 }
 0x154   : > { %796 = vtanh.f32 %v448_v50 }
 0x155   : > { %798 = vtanh.f32 %v446_v48 }
 0x15e   : > { %v797_v51 = vpop.eup %796 }
 0x15f   : > { %v799_v52 = vpop.eup %798  ;;  %555 = vmatprep.mubr.f32.mxu1 %v797_v51 }
 0x160   : > { %556 = vmatmul.mubr.f32.vlgmr.msra.gmra.mrb[0].mxu1 %v799_v52 }
 0x233   : > { %v691_v53 = vpop.f32.mrb[0].mxu1 }
 0x234   : > { %v692_v55 = vpop.f32.mrb[1].mxu1 }
 0x235   : > { %v693_v56 = vadd.f32 %v692_v55, %v691_v53 }
 0x237   : > { %v558_v57 = vadd.f32 %v693_v56, %v654_v54 }
 0x239   : > { %561 = vst [vmem:[#allocation7] sm:$0x3] %v558_v57 }
 0x23a PF: > { %p1072_p0 = scmp.eq.s32.totalorder %s641_s23, 2  ;;  %s907_s29 = smov [#allocation7]  }
 0x23b   : > { %s571_s16 = sshll.u32 %s907_s29, 4  ;;  %s572_s16 = int_to_ptr.vmem [resolvable:$true] %s571_s16 }
 0x23c   : > { %s828_s17 = scalar_lea.vmem %s572_s16, 32  ;;  %p835_p5 = scmp.lt.s32.totalorder %s572_s16, %s572_s16 }
 0x23d   : > { %p829_p1 = scmp.ne.s32.totalorder %s572_s16, %s828_s17  ;;  %p836_p6 = scmp.lt.s32.totalorder %s828_s17, %s828_s17 }
 0x23f   : > { %p830_p2 = pnand %p829_p1, %p1072_p0  ;;  %p837_p9 = por %p836_p6, %p835_p5 }
 0x241   : > { %p831_p4 = pneg %p830_p2 }
 0x243   : > { %p838_p11 = pnand %p837_p9, %p831_p4 }
 0x245   : > { %841 = shalt.err (!%p838_p11)
}
 0x246   : > { %s842_s23 = scalar_lea.hbm %s1118_s5, 32 }
 0x247   : > { %p843_p13 = scmp.ne.s32.totalorder %s1118_s5, %s842_s23  ;;  %p848_p8 = scmp.lt.u32.totalorder %s842_s23, %s1118_s5 }
 0x249   : > { %p844_p3 = pnand %p843_p13, %p1072_p0 }
 0x24b   : > { %p845_p7 = pneg %p844_p3 }
 0x24d   : > { %p850_p10 = pnand %p848_p8, %p845_p7 }
 0x24f   : > { %853 = shalt.err (!%p850_p10)
}
 0x250   : > { %739 = dma.vmem_to_hbm [thread:$0]  (%p1072_p0), %s572_s16, 32, %s1118_s5, [#allocation6]  }
 0x251   : > { %879 = dma.done.wait (%p1072_p0), [#allocation6], 32  }
 0x252   : > { %881 = vsyncadd (%p1072_p0), [#allocation6], 4294967264 }
 0x253 PF: > { %s17_s22 = sadd.s32 1, %s900_s22   ;;  %s1130_s18 = smov %s888_s19 }
 0x254   : > { %p14_p12 = scmp.ge.s32.totalorder %s17_s22, 5   ;;  %s1131_s19 = smov %s990_s30 }
 0x255   : > { %s1132_s20 = smov %s896_s21  ;;  %s1133_s21 = smov %s1135_s24 }
 0x256   :  { %16 = sbr.rel (!%p14_p12) target bundleno = 4 (0x4), region = 128 }
 0x25d   :  { %584 = vsyncpa [#allocation5], 1 }
 0x25e   :  { %586 = vsyncpa [#allocation5 + $0x1], 1 }
 0x25f   :  { %587 = vsyncpa [#allocation6], 1 }
 0x260   :  { %589 = vsyncpa [#allocation6 + $0x1], 1 }

</bundles_post_ra>
